<compile_context>
chip_gen: v7x
topology: tpu7x:2x2x1
jax: 0.10.0
libtpu: 0.0.40
codegen_flags: <defaults>
</compile_context>

<pallas_src>
import functools

import jax
import jax.numpy as jnp
from jax.experimental import pallas as pl
from jax.experimental.pallas import tpu as pltpu

FEWSHOT_WEIGHT = 2.0     # module __init__ default is 1.0; use 2.0 so weighting is visible
REDUCTION = "mean"       # matches module default


def weighted_ce_kernel(logits_ref, targets_ref, source_ref, out_ref, *,
                       n_true, block_rows, fewshot_weight, reduction):
    """One row-tile of weighted CE, accumulated into a resident (1,1) output.

    logits_ref : (TN, C) native-dtype VMEM tile
    targets_ref: (TN, 1) i32 VMEM tile
    source_ref : (TN, 1) f32 VMEM tile
    out_ref    : (1, 1)  f32 VMEM, constant block index -> accumulator
    """
    i = pl.program_id(0)

    @pl.when(i == 0)
    def _init():
        out_ref[...] = jnp.zeros_like(out_ref)

    logits = logits_ref[...].astype(jnp.float32)                 # (TN, C) f32 in-kernel
    tn, c = logits.shape

    # Stable log-sum-exp on the shifted logits.
    m = jnp.max(logits, axis=-1, keepdims=True)                  # (TN, 1)
    shifted = logits - m                                         # (TN, C)
    sum_exp = jnp.sum(jnp.exp(shifted), axis=-1, keepdims=True)  # (TN, 1)

    # Target-logit gather via compare+select (single VPU vsel + XLU sum).
    cls_iota = jax.lax.broadcasted_iota(jnp.int32, (tn, c), 1)   # (TN, C)
    tgt = targets_ref[...]                                       # (TN, 1) int32
    tgt_shifted = jnp.sum(jnp.where(cls_iota == tgt, shifted, 0.0),
                          axis=-1, keepdims=True)                # (TN, 1)

    ce = jnp.log(sum_exp) - tgt_shifted                          # (TN, 1) per-sample CE

    # Per-sample weights: source * fewshot_weight + (1 - source); stays (TN, 1).
    src = source_ref[...].astype(jnp.float32)
    weights = src * fewshot_weight + (1.0 - src)

    # Mask rows that are only padding (global row index >= true N).
    row_idx = i * block_rows + jax.lax.broadcasted_iota(jnp.int32, (tn, 1), 0)
    valid = (row_idx < n_true).astype(jnp.float32)

    tile_sum = jnp.sum(ce * weights * valid, keepdims=True)      # (1, 1)
    out_ref[...] += tile_sum

    @pl.when(i == pl.num_programs(0) - 1)
    def _finalize():
        if reduction == "mean":
            out_ref[...] = out_ref[...] / jnp.float32(n_true)
        # 'sum': accumulated value is already the answer.


def _choose_block_rows(n, c, itemsize):
    """Pick a row tile: multiple of 8, double-buffered logits well under VMEM."""
    budget_per_buf = 8 * 1024 * 1024                  # ~8 MiB per logits buffer (x2 pipelined)
    rows = budget_per_buf // max(1, c * itemsize)
    rows = max(8, (rows // 8) * 8)
    rows = min(rows, 512)                             # amortizes ~0.35us/step overhead
    n_up8 = ((n + 7) // 8) * 8
    return min(rows, n_up8)


def weighted_ce_loss(logits, targets, source,
                     fewshot_weight=FEWSHOT_WEIGHT, reduction=REDUCTION,
                     block_rows=None):
    """Pallas wrapper. logits: (N, C), targets: (N,) int, source: (N,) float."""
    n, c = logits.shape
    itemsize = jnp.dtype(logits.dtype).itemsize

    if block_rows is None:
        tn = _choose_block_rows(n, c, itemsize)
    else:
        tn = max(8, (int(block_rows) // 8) * 8)
        tn = min(tn, ((n + 7) // 8) * 8)

    n_pad = ((n + tn - 1) // tn) * tn
    if n_pad > n:
        pad = n_pad - n
        logits = jnp.pad(logits, ((0, pad), (0, 0)))
        targets = jnp.pad(targets, (0, pad))
        source = jnp.pad(source, (0, pad))

    targets2d = targets.reshape(n_pad, 1).astype(jnp.int32)
    source2d = source.reshape(n_pad, 1).astype(jnp.float32)

    grid = (n_pad // tn,)

    kernel = functools.partial(
        weighted_ce_kernel,
        n_true=n, block_rows=tn,
        fewshot_weight=float(fewshot_weight), reduction=reduction,
    )

    cost = pl.CostEstimate(
        flops=5 * n * c,
        transcendentals=n * c,
        bytes_accessed=n * c * itemsize + n * 8 + 4,
    )

    out = pl.pallas_call(
        kernel,
        out_shape=jax.ShapeDtypeStruct((1, 1), jnp.float32),
        grid=grid,
        in_specs=[
            pl.BlockSpec((tn, c), lambda i: (i, 0)),   # logits tile (native dtype)
            pl.BlockSpec((tn, 1), lambda i: (i, 0)),   # targets tile
            pl.BlockSpec((tn, 1), lambda i: (i, 0)),   # source tile
        ],
        out_specs=pl.BlockSpec((1, 1), lambda i: (0, 0)),  # resident accumulator
        compiler_params=pltpu.CompilerParams(
            dimension_semantics=("arbitrary",),        # reduction over row tiles
            vmem_limit_bytes=48 * 1024 * 1024,         # safe on v5e/v6e/v7x
        ),
        cost_estimate=cost,
    )(logits, targets2d, source2d)                     # no wrapper-side f32 cast
    return out[0, 0]


def _reference(logits, targets, source,
               fewshot_weight=FEWSHOT_WEIGHT, reduction=REDUCTION):
    """Pure-JAX reference matching the PyTorch module."""
    logits = logits.astype(jnp.float32)
    logp = jax.nn.log_softmax(logits, axis=-1)
    ce = -jnp.take_along_axis(logp, targets[:, None].astype(jnp.int32), axis=-1)[:, 0]
    src = source.astype(jnp.float32)
    weights = src * fewshot_weight + (1.0 - src)
    w_loss = ce * weights
    return jnp.mean(w_loss) if reduction == "mean" else jnp.sum(w_loss)


if __name__ == "__main__":
    key = jax.random.PRNGKey(0)
    k1, k2, k3, k4, k5, k6 = jax.random.split(key, 6)

    # Test 1: bf16 logits straight from HBM (no wrapper cast), lane-dense C=128.
    N1, C1 = 8, 128
    logits1 = jax.random.normal(k1, (N1, C1), dtype=jnp.float32).astype(jnp.bfloat16)
    targets1 = jax.random.randint(k2, (N1,), 0, C1, dtype=jnp.int32)
    source1 = jax.random.bernoulli(k3, 0.5, (N1,)).astype(jnp.float32)

    loss1 = jax.block_until_ready(weighted_ce_loss(logits1, targets1, source1))
    ref1 = _reference(logits1, targets1, source1)
    assert jnp.allclose(loss1, ref1, rtol=1e-4, atol=1e-4), (loss1, ref1)

    # Test 2: multi-step grid (block_rows=8), padded last tile, C not a multiple of 128
    # (legal: the block's class dim equals the full array dim).
    N2, C2 = 20, 40
    logits2 = jax.random.normal(k4, (N2, C2), dtype=jnp.float32)
    targets2 = jax.random.randint(k5, (N2,), 0, C2, dtype=jnp.int32)
    source2 = jax.random.bernoulli(k6, 0.5, (N2,)).astype(jnp.float32)

    loss2 = jax.block_until_ready(
        weighted_ce_loss(logits2, targets2, source2, block_rows=8))
    ref2 = _reference(logits2, targets2, source2)
    assert jnp.allclose(loss2, ref2, rtol=1e-4, atol=1e-4), (loss2, ref2)

    print("KERNEL_OK")
</pallas_src>

<mosaic_0001>
module attributes {stable_mosaic.version = 11 : i64} {
  func.func @weighted_ce_kernel(%arg0: i32, %arg1: memref<8x128xbf16, #tpu.memory_space<vmem>>, %arg2: memref<8x1xi32, #tpu.memory_space<vmem>>, %arg3: memref<8x1xf32, #tpu.memory_space<vmem>>, %arg4: memref<1x1xf32, #tpu.memory_space<vmem>>) attributes {dimension_semantics = [#tpu.dimension_semantics<arbitrary>], iteration_bounds = array<i64: 1>, scalar_prefetch = 0 : i64, scratch_operands = 0 : i64, tpu.core_type = #tpu.core_type<tc>, window_params = [{transform_indices = @transform_0, window_bounds = array<i64: 8, 128>}, {transform_indices = @transform_1, window_bounds = array<i64: 8, 1>}, {transform_indices = @transform_2, window_bounds = array<i64: 8, 1>}, {pipeline_mode = #tpu.pipeline_mode<synchronous>, transform_indices = @transform_3, window_bounds = array<i64: 1, 1>}]} {
    %c0_i32 = arith.constant 0 : i32
    %0 = arith.cmpi eq, %arg0, %c0_i32 : i32
    %1 = arith.extui %0 : i1 to i32
    %c0_i32_0 = arith.constant 0 : i32
    %2 = arith.cmpi ne, %1, %c0_i32_0 : i32
    scf.if %2 {
      %cst_19 = arith.constant 0.000000e+00 : f32
      %49 = vector.broadcast %cst_19 : f32 to vector<1x1xf32>
      %c0_20 = arith.constant 0 : index
      %c0_21 = arith.constant 0 : index
      %50 = vector.load %arg4[%c0_20, %c0_21] : memref<1x1xf32, #tpu.memory_space<vmem>>, vector<1x1xf32>
      tpu.vector_store %arg4[%c0_20, %c0_21], %49 {strides = array<i32>} : memref<1x1xf32, #tpu.memory_space<vmem>>, vector<1x1xf32>,
    } else {
    }
    %c0 = arith.constant 0 : index
    %c0_1 = arith.constant 0 : index
    %3 = vector.load %arg1[%c0, %c0_1] : memref<8x128xbf16, #tpu.memory_space<vmem>>, vector<8x128xbf16>
    %4 = arith.extf %3 : vector<8x128xbf16> to vector<8x128xf32>
    %cst = arith.constant dense<0xFF800000> : vector<8xf32>
    %5 = vector.multi_reduction <maximumf>, %4, %cst [1] : vector<8x128xf32> to vector<8xf32>
    %6 = vector.shape_cast %5 : vector<8xf32> to vector<8x1xf32>
    %7 = vector.broadcast %6 : vector<8x1xf32> to vector<8x128xf32>
    %8 = arith.subf %4, %7 : vector<8x128xf32>
    %9 = math.exp %8 : vector<8x128xf32>
    %cst_2 = arith.constant dense<0.000000e+00> : vector<8xf32>
    %10 = vector.multi_reduction <add>, %9, %cst_2 [1] : vector<8x128xf32> to vector<8xf32>
    %11 = vector.shape_cast %10 : vector<8xf32> to vector<8x1xf32>
    %12 = tpu.iota {dimensions = array<i32: 1>} : vector<8x128xi32>
    %c0_3 = arith.constant 0 : index
    %c0_4 = arith.constant 0 : index
    %13 = vector.load %arg2[%c0_3, %c0_4] : memref<8x1xi32, #tpu.memory_space<vmem>>, vector<8x1xi32>
    %14 = vector.broadcast %13 : vector<8x1xi32> to vector<8x128xi32>
    %15 = arith.cmpi eq, %12, %14 : vector<8x128xi32>
    %cst_5 = arith.constant 0.000000e+00 : f32
    %16 = vector.broadcast %cst_5 : f32 to vector<8x128xf32>
    %17 = arith.select %15, %8, %16 : vector<8x128xi1>, vector<8x128xf32>
    %cst_6 = arith.constant dense<0.000000e+00> : vector<8xf32>
    %18 = vector.multi_reduction <add>, %17, %cst_6 [1] : vector<8x128xf32> to vector<8xf32>
    %19 = vector.shape_cast %18 : vector<8xf32> to vector<8x1xf32>
    %20 = math.log %11 : vector<8x1xf32>
    %21 = arith.subf %20, %19 : vector<8x1xf32>
    %c0_7 = arith.constant 0 : index
    %c0_8 = arith.constant 0 : index
    %22 = vector.load %arg3[%c0_7, %c0_8] : memref<8x1xf32, #tpu.memory_space<vmem>>, vector<8x1xf32>
    %cst_9 = arith.constant 2.000000e+00 : f32
    %23 = vector.broadcast %cst_9 : f32 to vector<8x1xf32>
    %24 = arith.mulf %22, %23 : vector<8x1xf32>
    %cst_10 = arith.constant 1.000000e+00 : f32
    %25 = vector.broadcast %cst_10 : f32 to vector<8x1xf32>
    %26 = arith.subf %25, %22 : vector<8x1xf32>
    %27 = arith.addf %24, %26 : vector<8x1xf32>
    %c8_i32 = arith.constant 8 : i32
    %28 = arith.muli %arg0, %c8_i32 : i32
    %29 = tpu.iota {dimensions = array<i32: 0>} : vector<8x1xi32>
    %30 = vector.broadcast %28 : i32 to vector<8x1xi32>
    %31 = arith.addi %30, %29 : vector<8x1xi32>
    %c8_i32_11 = arith.constant 8 : i32
    %32 = vector.broadcast %c8_i32_11 : i32 to vector<8x1xi32>
    %33 = arith.cmpi slt, %31, %32 : vector<8x1xi32>
    %34 = arith.extui %33 : vector<8x1xi1> to vector<8x1xi32>
    %35 = arith.sitofp %34 : vector<8x1xi32> to vector<8x1xf32>
    %36 = arith.mulf %21, %27 : vector<8x1xf32>
    %37 = arith.mulf %36, %35 : vector<8x1xf32>
    %38 = vector.shape_cast %37 : vector<8x1xf32> to vector<1x8x1xf32>
    %cst_12 = arith.constant dense<0.000000e+00> : vector<1xf32>
    %39 = vector.multi_reduction <add>, %38, %cst_12 [1, 2] : vector<1x8x1xf32> to vector<1xf32>
    %40 = vector.shape_cast %39 : vector<1xf32> to vector<1x1x1xf32>
    %41 = vector.extract %40[0, 0, 0] : f32 from vector<1x1x1xf32>
    %42 = vector.broadcast %41 : f32 to vector<1x1xf32>
    %c0_13 = arith.constant 0 : index
    %c0_14 = arith.constant 0 : index
    %43 = vector.load %arg4[%c0_13, %c0_14] : memref<1x1xf32, #tpu.memory_space<vmem>>, vector<1x1xf32>
    %44 = arith.addf %43, %42 : vector<1x1xf32>
    %c0_15 = arith.constant 0 : index
    %c0_16 = arith.constant 0 : index
    %45 = vector.load %arg4[%c0_15, %c0_16] : memref<1x1xf32, #tpu.memory_space<vmem>>, vector<1x1xf32>
    tpu.vector_store %arg4[%c0_15, %c0_16], %44 {strides = array<i32>} : memref<1x1xf32, #tpu.memory_space<vmem>>, vector<1x1xf32>,
    %c0_i32_17 = arith.constant 0 : i32
    %46 = arith.cmpi eq, %arg0, %c0_i32_17 : i32
    %47 = arith.extui %46 : i1 to i32
    %c0_i32_18 = arith.constant 0 : i32
    %48 = arith.cmpi ne, %47, %c0_i32_18 : i32
    scf.if %48 {
      %c0_19 = arith.constant 0 : index
      %c0_20 = arith.constant 0 : index
      %49 = vector.load %arg4[%c0_19, %c0_20] : memref<1x1xf32, #tpu.memory_space<vmem>>, vector<1x1xf32>
      %cst_21 = arith.constant 8.000000e+00 : f32
      %50 = vector.broadcast %cst_21 : f32 to vector<1x1xf32>
      %51 = arith.divf %49, %50 : vector<1x1xf32>
      %c0_22 = arith.constant 0 : index
      %c0_23 = arith.constant 0 : index
      %52 = vector.load %arg4[%c0_22, %c0_23] : memref<1x1xf32, #tpu.memory_space<vmem>>, vector<1x1xf32>
      tpu.vector_store %arg4[%c0_22, %c0_23], %51 {strides = array<i32>} : memref<1x1xf32, #tpu.memory_space<vmem>>, vector<1x1xf32>,
    } else {
    }
    return
  }
  func.func @transform_0(%arg0: i32) -> (i32, i32) {
    %c0_i32 = arith.constant 0 : i32
    %c0_i32_0 = arith.constant 0 : i32
    return %arg0, %c0_i32 : i32, i32
  }
  func.func @transform_1(%arg0: i32) -> (i32, i32) {
    %c0_i32 = arith.constant 0 : i32
    %c0_i32_0 = arith.constant 0 : i32
    return %arg0, %c0_i32 : i32, i32
  }
  func.func @transform_2(%arg0: i32) -> (i32, i32) {
    %c0_i32 = arith.constant 0 : i32
    %c0_i32_0 = arith.constant 0 : i32
    return %arg0, %c0_i32 : i32, i32
  }
  func.func @transform_3(%arg0: i32) -> (i32, i32) {
    %c0_i32 = arith.constant 0 : i32
    %c0_i32_0 = arith.constant 0 : i32
    %c0_i32_1 = arith.constant 0 : i32
    return %c0_i32, %c0_i32_0 : i32, i32
  }
}

</mosaic_0001>

<bundles_post_ra>
// kernel: tpu_custom_call.1
= control target key start
LH: loop header
LB: loop body
LE: loop exit
PB: predicated region body
PF: predicated region fallthrough
CT: control target
= control target key end

     0   :  { %s175_s0 = inlined_call_operand.vmem [shape: bf16[8,128], index: 0, kind: input, shape index: {}]   ;;  %s176_s1 = inlined_call_operand.vmem [shape: s32[8,1], index: 1, kind: input, shape index: {}]   ;;  %s177_s2 = inlined_call_operand.vmem [shape: f32[8,1], index: 2, kind: input, shape index: {}]   ;;  %s178_s3 = inlined_call_operand.hbm [shape: f32[1,1], index: 3, kind: output, shape index: {}]  }
   0x1   :  { %v21_v0 = vld [vmem:[%s175_s0] sm:$0xf] }
   0x2   :  { %8 = vsyncpa [#allocation3], 0  ;;  %v22_v1 = vunpack.c.l.bf16 %v21_v0  ;;  %v128_v2 = vmov 0   ;;  %v32_v3 = vld [vmem:[%s176_s1] sm:$0xff]  ;;  %v30_v7 = vlaneseq  ;;  %vm57_vm1 = vcmask 7168  }
   0x3   :  { %99 = vset.pattern.permute.xlu0 %v128_v2  ;;  %v43_v13 = vld [vmem:[%s177_s2] sm:$0xff]  ;;  %vm19_vm2 = vcmask 0   ;;  %v129_v23 = vmov 0.0   ;;  %s130_s2 = smov [#allocation2]  }
   0x4   :  { %23 = vmax.xlane.f32.xlu0 %v22_v1  ;;  %v31_v8 = vand.u32 127, %v30_v7  ;;  %v44_v14 = vmul.f32 2.0, %v43_v13  ;;  %v45_v15 = vsub.f32 1.0, %v43_v13  ;;  %20 = vst.msk [vmem:[#allocation2] sm:$0x1] %vm19_vm2, %v129_v23  ;;  %s86_s17 = sshll.u32 %s130_s2, 4  ;;  %s87_s17 = int_to_ptr.vmem [resolvable:$true] %s86_s17 }
   0x5   :  { %s104_s18 = scalar_lea.vmem %s87_s17, 16  ;;  %s108_s19 = scalar_lea.vmem %s87_s17, 32 }
   0x6   :  { %v46_v18 = vadd.f32 %v45_v15, %v44_v14  ;;  %p105_p0 = scmp.ne.s32.totalorder %s87_s17, %s104_s18  ;;  %p109_p1 = scmp.lt.s32.totalorder %s87_s17, %s87_s17 }
   0x7   :  { %p110_p2 = scmp.lt.s32.totalorder %s108_s19, %s104_s18 }
   0x9   :  { %p111_p3 = por %p110_p2, %p109_p1 }
   0xb   :  { %v69_v31 = vld [vmem:[#allocation2] sm:$0x1]  ;;  %p112_p4 = pnand %p111_p3, %p105_p0 }
  0x1a   :  { %34 = vperm.xlu0 %99, %v32_v3  }
  0x91   :  { %v24_v4 = vpop.xlane.xlu0 %23 }
  0x92   :  { %v25_v5 = vsub.f32 %v22_v1, %v24_v4 }
  0x94   :  { %v26_v6 = vmul.f32 1.442695, %v25_v5 }
  0x96   :  { %100 = vpow2.f32 %v26_v6 }
  0x99   :  { %v35_v9 = vpop.permute.xlu0 %34 }
  0x9a   :  { %vm36_vm0 = vcmp.eq.s32.totalorder %v31_v8, %v35_v9 }
  0x9b   :  { %v37_v11 = vsel %vm36_vm0, %v25_v5, 0.0 }
  0xa0   :  { %v101_v10 = vpop.eup %100 }
  0xa1   :  { %28 = vadd.xlane.f32.xlu1 %v101_v10 }
  0xa5   :  { %38 = vadd.xlane.f32.xlu1 %v37_v11 }
 0x12e   :  { %v29_v12 = vpop.xlane.xlu1 %28 }
 0x12f   :  { %102 = vlog2.f32 %v29_v12 }
 0x132   :  { %v39_v19 = vpop.xlane.xlu1 %38 }
 0x139   :  { %v103_v16 = vpop.eup %102 }
 0x13a   :  { %v41_v17 = vmul.f32 0.6931472, %v103_v16 }
 0x13c   :  { %v42_v20 = vsub.f32 %v41_v17, %v39_v19 }
 0x13e   :  { %v55_v21 = vmul.f32 %v46_v18, %v42_v20 }
 0x140   :  { %v58_v22 = vsel %vm57_vm1, %v55_v21, 0.0 }
 0x141   :  { %59 = vadd.xlane.f32.xlu1 %v58_v22 }
 0x1ce   :  { %v60_v24 = vpop.xlane.xlu1 %59 }
 0x1cf   :  { %v61_v25 = vrot.slane %v60_v24, 4 }
 0x1d1   :  { %v62_v26 = vadd.f32 %v61_v25, %v60_v24 }
 0x1d3   :  { %v63_v27 = vrot.slane %v62_v26, 2 }
 0x1d5   :  { %v64_v28 = vadd.f32 %v63_v27, %v62_v26 }
 0x1d7   :  { %v65_v29 = vrot.slane %v64_v28, 1 }
 0x1d9   :  { %v66_v30 = vadd.f32 %v65_v29, %v64_v28 }
 0x1db   :  { %94 = vpush %v66_v30 }
 0x20c   :  { %s95_s1 = spop %94 }
 0x20d   :  { %v68_v32 = vstv %s95_s1 }
 0x20e   :  { %v70_v33 = vadd.f32 %v69_v31, %v68_v32 }
 0x210   :  { %72 = vst.msk [vmem:[#allocation2] sm:$0x1] %vm19_vm2, %v70_v33 }
 0x217   :  { %v76_v34 = vld [vmem:[#allocation2] sm:$0x1] }
 0x218   :  { %v78_v35 = vmul.f32 0.125, %v76_v34 }
 0x21a   :  { %79 = vst.msk [vmem:[#allocation2] sm:$0x1] %vm19_vm2, %v78_v35 }
 0x21b   :  { %115 = shalt.err (!%p112_p4)
}
 0x21c   :  { %s116_s22 = scalar_lea.hbm %s178_s3, 16 }
 0x21d   :  { %p117_p5 = scmp.ne.s32.totalorder %s178_s3, %s116_s22  ;;  %p120_p6 = scmp.lt.u32.totalorder %s116_s22, %s178_s3 }
 0x21f   :  { %p122_p7 = pnand %p120_p6, %p117_p5 }
 0x221   :  { %125 = shalt.err (!%p122_p7)
}
 0x222   :  { %89 = dma.vmem_to_hbm [thread:$0]  %s87_s17, 16, %s178_s3, [#allocation3]  }
 0x223   :  { %126 = dma.done.wait [#allocation3], 16  }
 0x224   :  { %127 = vsyncadd [#allocation3], 4294967280 }
 0x225   :  { %93 = vsyncpa [#allocation3], 1 }

</bundles_post_ra>
